<compile_context>
chip_gen: v5e
topology: v5e:2x2
jax: 0.10.0
libtpu: 0.0.40
codegen_flags: <defaults>
</compile_context>

<pallas_src>
import functools

import jax
import jax.numpy as jnp
from jax.experimental import pallas as pl
from jax.experimental.pallas import tpu as pltpu


# Sublane packing per element size (f32 -> 8, bf16 -> 16, int8/fp8 -> 32).
_SUBLANE_PACK = {4: 8, 2: 16, 1: 32}
_MIB = 1024 * 1024


def _rmsnorm_kernel(x_ref, w_ref, o_ref, *, eps, inv_dim, chunk):
    # x_ref: (tile_rows, dim_p), w_ref: (1, dim_p), o_ref: (tile_rows, dim_p).
    # Compute is chunked over row sub-tiles so the f32 temporaries stay a small
    # constant regardless of tile_rows (keeps VMEM for the DMA blocks).
    w = w_ref[...]                                    # hoisted out of the loop
    n_chunks = x_ref.shape[0] // chunk                # static

    def body(c, carry):
        r = pl.multiple_of(c * chunk, chunk)
        x32 = x_ref[pl.ds(r, chunk), :].astype(jnp.float32)        # x.float()
        ms = jnp.sum(x32 * x32, axis=-1, keepdims=True) * inv_dim  # mean(x^2,-1)
        normed = x32 * jax.lax.rsqrt(ms + eps)                     # x*rsqrt(ms+eps)
        # .type_as(x) BEFORE the weight multiply (torch semantics); weight was
        # pre-cast to x.dtype in the wrapper so the store stays lane-dense.
        o_ref[pl.ds(r, chunk), :] = normed.astype(o_ref.dtype) * w
        return carry

    jax.lax.fori_loop(0, n_chunks, body, 0, unroll=n_chunks <= 8)


def _device_kind() -> str:
    try:
        return jax.devices()[0].device_kind.lower()
    except Exception:
        return ""


def _vmem_capacity_bytes() -> int:
    """Physical VMEM of the current chip; device_kind-keyed fallback."""
    try:
        cap = getattr(pltpu.get_tpu_info(), "vmem_capacity_bytes", None)
        if cap:
            return int(cap)
    except Exception:
        pass
    # AOT / mocked compile: key off device_kind instead of silently assuming the
    # smallest part (which would halve tile sizes on v5e/v6e).
    kind = _device_kind()
    if "v7" in kind:
        return 64 * _MIB
    return 128 * _MIB  # v5e / v5p / v6e


def _num_tensorcores() -> int:
    """TensorCores sharing the 'parallel' grid axis (megacore sharding)."""
    kind = _device_kind()
    if "v7" in kind or "v4" in kind or "v5p" in kind:
        return 2
    return 1


def _pick_tiles(rows, dim, itemsize, vmem_bytes, num_cores):
    """Pick (tile_rows, chunk_rows): DMA block rows and inner compute chunk."""
    pack = _SUBLANE_PACK.get(itemsize, 8)
    rows_padded = -(-rows // pack) * pack

    # Inner compute chunk: bound the ~3 live f32 temporaries to ~4 MiB so they
    # never steal VMEM from the DMA tiles, regardless of dim.
    chunk = max(pack, (4 * _MIB // (3 * dim * 4)) // pack * pack)
    chunk = min(chunk, max(pack, rows_padded))

    # VMEM budget for the double-buffered in/out tiles (generation aware).
    if vmem_bytes >= 96 * _MIB:            # 128 MiB parts: v5e / v5p / v6e
        budget = int(vmem_bytes * 0.45)
    else:                                  # 64 MiB parts: v7x
        budget = int(vmem_bytes * 0.40)
    budget -= 3 * chunk * dim * 4          # inner-chunk f32 temporaries
    budget -= 2 * dim * itemsize           # weight block
    per_row_bytes = 2 * 2 * dim * itemsize  # double-buffered input + output
    tile = max(chunk, budget // max(per_row_bytes, 1))

    # Per-block byte cap (~16 MiB of x.dtype per input block) instead of a
    # fixed row cap: narrow dims still get big DMA blocks.
    tile = min(tile, max(chunk, 16 * _MIB // max(dim * itemsize, 1)))

    # Don't allocate a tile larger than the problem itself.
    tile = min(tile, max(chunk, rows_padded))

    # v7x: ensure at least num_cores grid steps so no TensorCore idles.
    if num_cores > 1 and rows_padded > chunk:
        per_core = -(-rows_padded // num_cores)
        per_core = max(chunk, per_core // chunk * chunk)
        tile = min(tile, per_core)

    # tile must be a multiple of the inner chunk (and stays >= chunk).
    tile = max(chunk, tile // chunk * chunk)

    # Prefer a grid length that is a multiple of num_cores when the grid is
    # short (load balance); for long grids the imbalance is negligible.
    grid_len = -(-rows // tile)
    if num_cores > 1 and grid_len < 8 and grid_len % num_cores != 0:
        target = -(-grid_len // num_cores) * num_cores
        cand = -(-rows // target)
        cand = max(chunk, -(-cand // chunk) * chunk)
        if (-(-rows // cand)) % num_cores == 0:
            tile = cand

    return int(tile), int(chunk)


def rmsnorm(x, weight, eps: float, tile_rows=None, chunk_rows=None):
    """RMSNorm over the last axis of x.

    x: [..., dim]  (any leading dims)
    weight: [dim]  (cast to x.dtype; output is x.dtype)
    """
    orig_shape = x.shape
    dim = orig_shape[-1]
    rows = 1
    for s in orig_shape[:-1]:
        rows *= s
    x2d = x.reshape(rows, dim)

    # Weight & output in x.dtype (halves writeback bytes for bf16 models).
    w2d = weight.reshape(1, dim).astype(x.dtype)

    # Keep the output store lane-dense: zero-pad the feature axis to a multiple
    # of 128 lanes in the exception case (zeros don't change sum(x^2); padded
    # columns are sliced off below). No-op for standard LLM dims.
    dim_pad = (-dim) % 128
    dim_p = dim + dim_pad
    if dim_pad:
        x2d = jnp.pad(x2d, ((0, 0), (0, dim_pad)))
        w2d = jnp.pad(w2d, ((0, 0), (0, dim_pad)))

    itemsize = jnp.dtype(x.dtype).itemsize
    vmem_bytes = _vmem_capacity_bytes()
    num_cores = _num_tensorcores()
    if tile_rows is None:
        tile_rows, auto_chunk = _pick_tiles(rows, dim_p, itemsize, vmem_bytes,
                                            num_cores)
        if chunk_rows is None:
            chunk_rows = auto_chunk
    if chunk_rows is None or tile_rows % chunk_rows != 0:
        chunk_rows = tile_rows

    grid = (pl.cdiv(rows, tile_rows),)  # ragged last block handled by Pallas
    inv_dim = 1.0 / float(dim)          # normalize by the ORIGINAL dim

    # Raise the scoped-VMEM limit just enough for the chosen blocks + headroom,
    # capped at ~75% of physical (~96 MiB on v5e/v6e, ~48 MiB on v7x).
    io_bytes = 2 * 2 * tile_rows * dim_p * itemsize + 2 * dim_p * itemsize
    tmp_bytes = 3 * chunk_rows * dim_p * 4
    vmem_limit = min(int(vmem_bytes * 0.75), io_bytes + tmp_bytes + 8 * _MIB)
    vmem_limit = max(vmem_limit, 32 * _MIB)

    out = pl.pallas_call(
        functools.partial(_rmsnorm_kernel, eps=eps, inv_dim=inv_dim,
                          chunk=chunk_rows),
        out_shape=jax.ShapeDtypeStruct((rows, dim_p), x.dtype),
        grid_spec=pltpu.PrefetchScalarGridSpec(
            num_scalar_prefetch=0,
            grid=grid,
            in_specs=[
                pl.BlockSpec((tile_rows, dim_p), lambda i: (i, 0)),
                pl.BlockSpec((1, dim_p), lambda i: (0, 0)),
            ],
            out_specs=pl.BlockSpec((tile_rows, dim_p), lambda i: (i, 0)),
        ),
        compiler_params=pltpu.CompilerParams(
            dimension_semantics=("parallel",),
            vmem_limit_bytes=int(vmem_limit),
        ),
    )(x2d, w2d)

    if dim_pad:
        out = out[:, :dim]
    return out.reshape(orig_shape)


if __name__ == "__main__":
    batch, seq, dim = 2, 8, 128
    eps = 1e-6

    key = jax.random.PRNGKey(0)
    x = jax.random.normal(key, (batch, seq, dim), dtype=jnp.float32)

    # Deterministic parameter init: weight = ones(dim), as in the module's __init__.
    weight = jnp.ones((dim,), dtype=jnp.float32)

    out = rmsnorm(x, weight, eps)
    out = jax.block_until_ready(out)

    # Reference check in plain JAX (same math as the torch forward).
    x32 = x.astype(jnp.float32)
    ref = (x32 * jax.lax.rsqrt(jnp.mean(x32 * x32, axis=-1, keepdims=True) + eps)
           ).astype(x.dtype) * weight.astype(x.dtype)
    assert out.shape == x.shape
    assert out.dtype == x.dtype
    assert jnp.allclose(out, ref, atol=1e-5, rtol=1e-5)

    # bf16 sanity check with a ragged row count (exercises the cdiv grid path
    # and the bf16-in / bf16-out contract).
    xb = jax.random.normal(jax.random.PRNGKey(1), (3, 5, dim)).astype(jnp.bfloat16)
    outb = jax.block_until_ready(rmsnorm(xb, weight, eps))
    xb32 = xb.astype(jnp.float32)
    refb = (xb32 * jax.lax.rsqrt(jnp.mean(xb32 * xb32, axis=-1, keepdims=True) + eps)
            ).astype(jnp.bfloat16) * weight.astype(jnp.bfloat16)
    assert outb.shape == xb.shape
    assert outb.dtype == jnp.bfloat16
    assert jnp.allclose(outb.astype(jnp.float32), refb.astype(jnp.float32),
                        atol=2e-2, rtol=2e-2)

    print("KERNEL_OK")
</pallas_src>

<mosaic_0001>
module attributes {stable_mosaic.version = 11 : i64} {
  func.func @_rmsnorm_kernel(%arg0: i32, %arg1: memref<16x128xf32, #tpu.memory_space<vmem>>, %arg2: memref<1x128xf32, #tpu.memory_space<vmem>>, %arg3: memref<16x128xf32, #tpu.memory_space<vmem>>) attributes {dimension_semantics = [#tpu.dimension_semantics<parallel>], iteration_bounds = array<i64: 1>, scalar_prefetch = 0 : i64, scratch_operands = 0 : i64, tpu.core_type = #tpu.core_type<tc>, window_params = [{transform_indices = @transform_0, window_bounds = array<i64: 16, 128>}, {pipeline_mode = #tpu.pipeline_mode<synchronous>, transform_indices = @transform_1, window_bounds = array<i64: 1, 128>}, {transform_indices = @transform_2, window_bounds = array<i64: 16, 128>}]} {
    %c0 = arith.constant 0 : index
    %c0_0 = arith.constant 0 : index
    %0 = vector.load %arg2[%c0, %c0_0] : memref<1x128xf32, #tpu.memory_space<vmem>>, vector<1x128xf32>
    %c0_i32 = arith.constant 0 : i32
    %c16_i32 = arith.constant 16 : i32
    %1 = arith.muli %c0_i32, %c16_i32 : i32
    %2 = tpu.assume_multiple %1, 16 : i32
    %3 = arith.index_cast %2 : i32 to index
    %c0_1 = arith.constant 0 : index
    %4 = vector.load %arg1[%3, %c0_1] : memref<16x128xf32, #tpu.memory_space<vmem>>, vector<16x128xf32>
    %5 = arith.mulf %4, %4 : vector<16x128xf32>
    %cst = arith.constant dense<0.000000e+00> : vector<16xf32>
    %6 = vector.multi_reduction <add>, %5, %cst [1] : vector<16x128xf32> to vector<16xf32>
    %7 = vector.shape_cast %6 : vector<16xf32> to vector<16x1xf32>
    %cst_2 = arith.constant 7.812500e-03 : f32
    %8 = vector.broadcast %cst_2 : f32 to vector<16x1xf32>
    %9 = arith.mulf %7, %8 : vector<16x1xf32>
    %cst_3 = arith.constant 9.99999997E-7 : f32
    %10 = vector.broadcast %cst_3 : f32 to vector<16x1xf32>
    %11 = arith.addf %9, %10 : vector<16x1xf32>
    %12 = math.rsqrt %11 : vector<16x1xf32>
    %13 = vector.broadcast %12 : vector<16x1xf32> to vector<16x128xf32>
    %14 = arith.mulf %4, %13 : vector<16x128xf32>
    %15 = vector.broadcast %0 : vector<1x128xf32> to vector<16x128xf32>
    %16 = arith.mulf %14, %15 : vector<16x128xf32>
    %17 = arith.index_cast %2 : i32 to index
    %c0_4 = arith.constant 0 : index
    %18 = vector.load %arg3[%17, %c0_4] : memref<16x128xf32, #tpu.memory_space<vmem>>, vector<16x128xf32>
    tpu.vector_store %arg3[%17, %c0_4], %16 {strides = array<i32>} : memref<16x128xf32, #tpu.memory_space<vmem>>, vector<16x128xf32>,
    %c1_i32 = arith.constant 1 : i32
    return
  }
  func.func @transform_0(%arg0: i32) -> (i32, i32) {
    %c0_i32 = arith.constant 0 : i32
    %c0_i32_0 = arith.constant 0 : i32
    return %arg0, %c0_i32 : i32, i32
  }
  func.func @transform_1(%arg0: i32) -> (i32, i32) {
    %c0_i32 = arith.constant 0 : i32
    %c0_i32_0 = arith.constant 0 : i32
    %c0_i32_1 = arith.constant 0 : i32
    return %c0_i32, %c0_i32_0 : i32, i32
  }
  func.func @transform_2(%arg0: i32) -> (i32, i32) {
    %c0_i32 = arith.constant 0 : i32
    %c0_i32_0 = arith.constant 0 : i32
    return %arg0, %c0_i32 : i32, i32
  }
}

</mosaic_0001>

<bundles_post_ra>
// kernel: tpu_custom_call.1
= control target key start
LH: loop header
LB: loop body
LE: loop exit
PB: predicated region body
PF: predicated region fallthrough
CT: control target
= control target key end

     0   :  { %7 = vsyncpa [#allocation3], 0  ;;  %s227_s0 = inlined_call_operand.hbm [shape: f32[16,128], index: 0, kind: input, shape index: {}]   ;;  %s228_s1 = inlined_call_operand.hbm [shape: f32[1,128], index: 1, kind: input, shape index: {}]   ;;  %s229_s2 = inlined_call_operand.hbm [shape: f32[16,128], index: 2, kind: output, shape index: {}]  }
   0x1   :  { %8 = vsyncpa [#allocation6], 0 }
   0x2   :  { %9 = vsyncpa [#allocation4], 0  ;;  %s14_s11 = sshll.u32 %s227_s0, 4  ;;  %s192_s12 = smov [#allocation2]   ;;  %s15_s11 = int_to_ptr.hbm [resolvable:$true] %s14_s11 }
   0x3   :  { %s16_s13 = sshll.u32 %s192_s12, 4  ;;  %s28_s16 = sshll.u32 %s228_s1, 4  ;;  %s17_s13 = int_to_ptr.vmem [resolvable:$true] %s16_s13  ;;  %s29_s16 = int_to_ptr.hbm [resolvable:$true] %s28_s16 }
   0x4   :  { %s193_s17 = smov 128   ;;  %s194_s18 = smov 8  }
   0x5   :  { %22 = dma.hbm_to_vmem [thread:$0]  %s15_s11, 256, %s17_s13, [#allocation3], %s193_s17, %s193_s17, %s194_s18  }
   0x6   :  { %s195_s19 = smov [#allocation5]  }
   0x7   :  { %s30_s20 = sshll.u32 %s195_s19, 4  ;;  %s31_s20 = int_to_ptr.vmem [resolvable:$true] %s30_s20 }
   0x8   :  { %33 = dma.hbm_to_vmem [thread:$0]  %s29_s16, 16, %s31_s20, [#allocation6]  }
   0x9   :  { %186 = dma.done.wait [#allocation3], 256  }
   0xa   :  { %187 = vsyncadd [#allocation3], 4294967040 }
   0xb   :  { %188 = dma.done.wait [#allocation6], 16  }
   0xc   :  { %189 = vsyncadd [#allocation6], 4294967280  ;;  %v43_v0 = vld [vmem:[#allocation2] sm:$0xff]  ;;  %v44_v2 = vld [vmem:[#allocation2 + $0x8] sm:$0xff]  ;;  %s196_s0 = smov [#allocation7]   ;;  %s90_s23 = sshll.u32 %s229_s2, 4  ;;  %s91_s23 = int_to_ptr.hbm [resolvable:$true] %s90_s23 }
   0xd   :  { %v45_v1 = vmul.f32 %v43_v0, %v43_v0  ;;  %v46_v3 = vmul.f32 %v44_v2, %v44_v2  ;;  %v109_v18 = vld [vmem:[#allocation5] ss:$0 sm:$0xff]  ;;  %s88_s1 = sshll.u32 %s196_s0, 4  ;;  %s89_s1 = int_to_ptr.vmem [resolvable:$true] %s88_s1 }
   0xf   :  { %47 = vadd.xlane.f32.xlu0 %v45_v1 }
  0x17   :  { %49 = vadd.xlane.f32.xlu0 %v46_v3 }
  0x82   :  { %v48_v4 = vpop.xlane.xlu0 %47 }
  0x83   :  { %v51_v5 = vmul.f32 0.0078125, %v48_v4 }
  0x85   :  { %v53_v6 = vadd.f32 1e-06, %v51_v5 }
  0x87   :  { %110 = vrsqrt.f32 %v53_v6  ;;  %vm61_vm1 = vweird.f32 %v53_v6 }
  0x8a   :  { %v50_v7 = vpop.xlane.xlu0 %49 }
  0x8b   :  { %v52_v8 = vmul.f32 0.0078125, %v50_v7 }
  0x8d   :  { %v111_v9 = vpop.eup %110  ;;  %v54_v10 = vadd.f32 1e-06, %v52_v8 }
  0x8e   :  { %v56_v11 = vmul.f32 %v111_v9, %v53_v6  ;;  %vm62_vm0 = vweird.f32 %v111_v9 }
  0x8f   :  { %112 = vrsqrt.f32 %v54_v10  ;;  %vm63_vm2 = vmor %vm61_vm1, %vm62_vm0  ;;  %vm71_vm4 = vweird.f32 %v54_v10 }
  0x90   :  { %v57_v12 = vmul.f32 %v111_v9, %v56_v11 }
  0x92   :  { %v58_v13 = vmul.f32 0.5, %v57_v12 }
  0x94   :  { %v59_v14 = vsub.f32 1.5, %v58_v13 }
  0x95   :  { %v113_v15 = vpop.eup %112 }
  0x96   :  { %v60_v16 = vmul.f32 %v111_v9, %v59_v14  ;;  %v66_v17 = vmul.f32 %v113_v15, %v54_v10  ;;  %vm72_vm3 = vweird.f32 %v113_v15 }
  0x97   :  { %vm73_vm5 = vmor %vm71_vm4, %vm72_vm3 }
  0x98   :  { %v64_v19 = vsel %vm63_vm2, %v111_v9, %v60_v16  ;;  %v67_v20 = vmul.f32 %v113_v15, %v66_v17 }
  0x99   :  { %v75_v21 = vmul.f32 %v64_v19, %v43_v0 }
  0x9a   :  { %v68_v22 = vmul.f32 0.5, %v67_v20 }
  0x9b   :  { %v80_v23 = vmul.f32 %v109_v18, %v75_v21 }
  0x9c   :  { %v69_v24 = vsub.f32 1.5, %v68_v22 }
  0x9d   :  { %82 = vst [vmem:[#allocation7] sm:$0xff] %v80_v23 }
  0x9e   :  { %v70_v25 = vmul.f32 %v113_v15, %v69_v24 }
  0xa0   :  { %v74_v26 = vsel %vm73_vm5, %v113_v15, %v70_v25 }
  0xa1   :  { %v76_v27 = vmul.f32 %v74_v26, %v44_v2 }
  0xa3   :  { %v81_v28 = vmul.f32 %v109_v18, %v76_v27 }
  0xa5   :  { %83 = vst [vmem:[#allocation7 + $0x8] sm:$0xff] %v81_v28 }
  0xa6   :  { %96 = dma.vmem_to_hbm [thread:$0]  %s89_s1, 256, %s91_s23, [#allocation4], %s193_s17, %s193_s17, %s194_s18  }
  0xa7   :  { %190 = dma.done.wait [#allocation4], 256  }
  0xa8   :  { %191 = vsyncadd [#allocation4], 4294967040 }
  0xa9   :  { %101 = vsyncpa [#allocation3], 1 }
  0xaa   :  { %102 = vsyncpa [#allocation6], 1 }
  0xab   :  { %103 = vsyncpa [#allocation4], 1 }

</bundles_post_ra>
